<compile_context>
chip_gen: v7x
topology: tpu7x:2x2x1
jax: 0.10.0
libtpu: 0.0.40
codegen_flags: <defaults>
</compile_context>

<pallas_src>
import functools

import jax
import jax.numpy as jnp
from jax import lax
from jax.experimental import pallas as pl
from jax.experimental.pallas import tpu as pltpu

_LANES = 128
_MIB = 1024 * 1024


def _se_kernel(x_ref, w1_ref, w2_ref, out_ref, acc_ref, *, inv_hw):
    # x_ref  : (Bt, C, HWt)    spatial tile, native dtype
    # w1_ref : (Cr, C)  f32    fc1 weight (torch natural layout), lane-dense
    # w2_ref : (Cr, C)  f32    fc2 weight transposed, lane-dense
    # out_ref: (Bt, 1, C)      sigmoid gate
    # acc_ref: (Bt, C)  f32    running spatial sums
    k = pl.program_id(1)

    @pl.when(k == 0)
    def _init():
        acc_ref[...] = jnp.zeros_like(acc_ref)

    n_chunks = x_ref.shape[-1] // _LANES

    if n_chunks <= 16:
        # Per-chunk ref loads + pairwise tree reduction: no whole-tile value
        # (vreg-pressure hazard) and no serial dependent-add chain.
        parts = [x_ref[:, :, j * _LANES:(j + 1) * _LANES].astype(jnp.float32)
                 for j in range(n_chunks)]
        while len(parts) > 1:
            nxt = [parts[i] + parts[i + 1] for i in range(0, len(parts) - 1, 2)]
            if len(parts) % 2:
                nxt.append(parts[-1])
            parts = nxt
        partial = parts[0]
    else:
        # Large tiles: bounded-live-range loop with enough unroll for the LLO
        # scheduler to hide load latency.
        def body(j, carry):
            off = pl.multiple_of(j * _LANES, _LANES)
            return carry + x_ref[:, :, pl.ds(off, _LANES)].astype(jnp.float32)

        init = jnp.zeros(x_ref.shape[:2] + (_LANES,), jnp.float32)
        partial = lax.fori_loop(0, n_chunks, body, init, unroll=8)

    # One XLU lane-reduce per step (XLU has total slack in a DMA-bound kernel);
    # the accumulator RMW is only (Bt, C).
    acc_ref[...] += jnp.sum(partial, axis=-1)

    @pl.when(k == pl.num_programs(1) - 1)
    def _finalize():
        # AdaptiveAvgPool2d(1): divide the accumulated sum by the true H*W.
        pooled = acc_ref[...] * inv_hw                              # (Bt, C) f32
        # fc1 -> ReLU -> fc2 -> Sigmoid, once per B-tile.
        h = lax.dot_general(pooled, w1_ref[...],
                            dimension_numbers=(((1,), (1,)), ((), ())),
                            preferred_element_type=jnp.float32)     # (Bt, Cr)
        h = jnp.maximum(h, 0.0)
        y = jnp.dot(h, w2_ref[...], preferred_element_type=jnp.float32)  # (Bt, C)
        y = jax.nn.sigmoid(y)
        out_ref[...] = y[:, None, :].astype(out_ref.dtype)


def _vmem_plan():
    """(vmem_limit_bytes, per-input-buffer byte budget), generation-aware."""
    cap = 64 * _MIB  # conservative default (v7x physical VMEM)
    try:
        info = pltpu.get_tpu_info()
        cap = int(getattr(info, "vmem_capacity_bytes", cap) or cap)
    except Exception:
        pass
    if cap >= 96 * _MIB:
        # v5e / v6e: 128 MiB physical.  Raise the scoped limit explicitly
        # (v5e default is only 16 MiB) and allow ~20 MiB per input buffer
        # (~40 MiB double-buffered).
        return 100 * _MIB, 20 * _MIB
    # v7x: 64 MiB physical / 32 MiB default scoped.  Budget accounts for
    # 2x input tile + acc scratch + 2x weights + output + internal scratch.
    return 48 * _MIB, 10 * _MIB


def se_layer(x_nchw, w1_cr_c, w2_cr_c):
    """SELayer forward.

    x_nchw:  (B, C, H, W)          (NCHW, same as PyTorch).
    w1_cr_c: (C//reduction, C)     fc1 weight, torch-natural layout (bias=False).
    w2_cr_c: (C//reduction, C)     fc2 weight TRANSPOSED (bias=False).
    returns (B, C, 1, 1) sigmoid gate.
    """
    b, c, h, w = x_nchw.shape
    cr = w1_cr_c.shape[0]
    hw = h * w
    itemsize = jnp.dtype(x_nchw.dtype).itemsize

    vmem_limit, buf_budget = _vmem_plan()

    # ---- Tile selection: grow HWt first (no artificial cap), then Bt. ------
    m_raw = pl.cdiv(hw, _LANES)                       # 128-lane chunks along HW
    bytes_per_chunk = c * _LANES * itemsize
    max_chunks = max(1, buf_budget // bytes_per_chunk)
    k_steps = pl.cdiv(m_raw, max_chunks) if m_raw > max_chunks else 1
    d = pl.cdiv(m_raw, k_steps)                       # chunks per k step
    hwt = d * _LANES
    hw_p = k_steps * hwt                              # padding < one tile

    x_flat = x_nchw.reshape(b, c, hw)
    if hw_p != hw:
        # Zero padding does not change the sum; the mean divides by true H*W.
        x_flat = jnp.pad(x_flat, ((0, 0), (0, 0), (0, hw_p - hw)))

    # B-tile under the remaining budget; keep >= 2 B-blocks when possible so
    # the "parallel" B axis can shard across both TensorCores (v7x megacore).
    # TODO(synk): for B == 1 on v7x one TC idles; a parallel HW split with a
    # cross-core combine would recover it.
    tile_bytes = c * hwt * itemsize
    max_bt = max(1, min(b // 2 if b >= 2 else 1, buf_budget // tile_bytes))
    bt = 1
    for cand in range(1, min(b, max_bt) + 1):
        if b % cand == 0:
            bt = cand

    grid = (b // bt, k_steps)
    kernel = functools.partial(_se_kernel, inv_hw=1.0 / float(hw))

    # Weights in f32, lane-dense (Cr, C): no per-finalize casts, no lane-sparse
    # MXU operands.
    w1_f32 = w1_cr_c.astype(jnp.float32)
    w2_f32 = w2_cr_c.astype(jnp.float32)

    cost = pl.CostEstimate(
        flops=2 * b * c * hw + 4 * b * c * cr,
        transcendentals=b * c,
        bytes_accessed=(b * c * hw_p * itemsize
                        + 2 * cr * c * 4
                        + b * c * itemsize),
    )

    out = pl.pallas_call(
        kernel,
        out_shape=jax.ShapeDtypeStruct((b, 1, c), x_nchw.dtype),
        grid=grid,
        in_specs=[
            pl.BlockSpec((bt, c, hwt), lambda i, k: (i, 0, k)),
            pl.BlockSpec((cr, c), lambda i, k: (0, 0)),   # fetched once
            pl.BlockSpec((cr, c), lambda i, k: (0, 0)),   # fetched once
        ],
        out_specs=pl.BlockSpec((bt, 1, c), lambda i, k: (i, 0, 0)),
        scratch_shapes=[pltpu.VMEM((bt, c), jnp.float32)],
        compiler_params=pltpu.CompilerParams(
            dimension_semantics=("parallel", "arbitrary"),
            vmem_limit_bytes=int(vmem_limit)),
        cost_estimate=cost,
    )(x_flat, w1_f32, w2_f32)

    return out.reshape(b, c, 1, 1)


def _reference(x_nchw, w1_cr_c, w2_cr_c):
    """Pure-JAX reference (mirrors the PyTorch forward)."""
    b, c, _, _ = x_nchw.shape
    pooled = jnp.mean(x_nchw.astype(jnp.float32), axis=(2, 3))      # (B, C)
    h = jnp.maximum(pooled @ w1_cr_c.astype(jnp.float32).T, 0.0)     # fc1 + ReLU
    y = jax.nn.sigmoid(h @ w2_cr_c.astype(jnp.float32))              # fc2 + Sigmoid
    return y.reshape(b, c, 1, 1).astype(x_nchw.dtype)


if __name__ == "__main__":
    key = jax.random.PRNGKey(0)
    kx, k1, k2 = jax.random.split(key, 3)

    B, C, H, W = 2, 64, 16, 16
    reduction = 16
    Cr = C // reduction  # 4

    x = jax.random.normal(kx, (B, C, H, W), dtype=jnp.float32)
    # Deterministic "Linear(bias=False)" weights:
    #   w1 = torch fc1.weight, natural layout (Cr, C)
    #   w2 = torch fc2.weight.T, layout (Cr, C)
    w1 = jax.random.normal(k1, (Cr, C), dtype=jnp.float32) * 0.1
    w2 = jax.random.normal(k2, (Cr, C), dtype=jnp.float32) * 0.1

    out = se_layer(x, w1, w2)
    out = jax.block_until_ready(out)

    ref = _reference(x, w1, w2)
    assert out.shape == (B, C, 1, 1), out.shape
    assert jnp.allclose(out, ref, atol=1e-5, rtol=1e-5), "mismatch vs reference"

    print("KERNEL_OK")
</pallas_src>

<mosaic_0001>
module attributes {stable_mosaic.version = 11 : i64} {
  func.func @_se_kernel(%arg0: i32, %arg1: i32, %arg2: memref<1x64x256xf32, #tpu.memory_space<vmem>>, %arg3: memref<4x64xf32, #tpu.memory_space<vmem>>, %arg4: memref<4x64xf32, #tpu.memory_space<vmem>>, %arg5: memref<1x1x64xf32, #tpu.memory_space<vmem>>, %arg6: memref<1x64xf32, #tpu.memory_space<vmem>>) attributes {dimension_semantics = [#tpu.dimension_semantics<parallel>, #tpu.dimension_semantics<arbitrary>], iteration_bounds = array<i64: 2, 1>, scalar_prefetch = 0 : i64, scratch_operands = 1 : i64, tpu.core_type = #tpu.core_type<tc>, window_params = [{transform_indices = @transform_0, window_bounds = array<i64: 1, 64, 256>}, {pipeline_mode = #tpu.pipeline_mode<synchronous>, transform_indices = @transform_1, window_bounds = array<i64: 4, 64>}, {pipeline_mode = #tpu.pipeline_mode<synchronous>, transform_indices = @transform_2, window_bounds = array<i64: 4, 64>}, {transform_indices = @transform_3, window_bounds = array<i64: 1, 1, 64>}]} {
    %c0_i32 = arith.constant 0 : i32
    %0 = arith.cmpi eq, %arg1, %c0_i32 : i32
    %1 = arith.extui %0 : i1 to i32
    %c0_i32_0 = arith.constant 0 : i32
    %2 = arith.cmpi ne, %1, %c0_i32_0 : i32
    scf.if %2 {
      %cst_11 = arith.constant 0.000000e+00 : f32
      %13 = vector.broadcast %cst_11 : f32 to vector<1x64xf32>
      %c0_12 = arith.constant 0 : index
      %c0_13 = arith.constant 0 : index
      %14 = vector.load %arg6[%c0_12, %c0_13] : memref<1x64xf32, #tpu.memory_space<vmem>>, vector<1x64xf32>
      tpu.vector_store %arg6[%c0_12, %c0_13], %13 {strides = array<i32>} : memref<1x64xf32, #tpu.memory_space<vmem>>, vector<1x64xf32>,
    } else {
    }
    %c0 = arith.constant 0 : index
    %c0_1 = arith.constant 0 : index
    %c0_2 = arith.constant 0 : index
    %3 = vector.load %arg2[%c0, %c0_1, %c0_2] : memref<1x64x256xf32, #tpu.memory_space<vmem>>, vector<1x64x128xf32>
    %c0_3 = arith.constant 0 : index
    %c0_4 = arith.constant 0 : index
    %c128 = arith.constant 128 : index
    %4 = vector.load %arg2[%c0_3, %c0_4, %c128] : memref<1x64x256xf32, #tpu.memory_space<vmem>>, vector<1x64x128xf32>
    %5 = arith.addf %3, %4 : vector<1x64x128xf32>
    %c0_5 = arith.constant 0 : index
    %c0_6 = arith.constant 0 : index
    %6 = vector.load %arg6[%c0_5, %c0_6] : memref<1x64xf32, #tpu.memory_space<vmem>>, vector<1x64xf32>
    %cst = arith.constant dense<0.000000e+00> : vector<1x64xf32>
    %7 = vector.multi_reduction <add>, %5, %cst [2] : vector<1x64x128xf32> to vector<1x64xf32>
    %8 = arith.addf %6, %7 : vector<1x64xf32>
    %c0_7 = arith.constant 0 : index
    %c0_8 = arith.constant 0 : index
    %9 = vector.load %arg6[%c0_7, %c0_8] : memref<1x64xf32, #tpu.memory_space<vmem>>, vector<1x64xf32>
    tpu.vector_store %arg6[%c0_7, %c0_8], %8 {strides = array<i32>} : memref<1x64xf32, #tpu.memory_space<vmem>>, vector<1x64xf32>,
    %c0_i32_9 = arith.constant 0 : i32
    %10 = arith.cmpi eq, %arg1, %c0_i32_9 : i32
    %11 = arith.extui %10 : i1 to i32
    %c0_i32_10 = arith.constant 0 : i32
    %12 = arith.cmpi ne, %11, %c0_i32_10 : i32
    scf.if %12 {
      %c0_11 = arith.constant 0 : index
      %c0_12 = arith.constant 0 : index
      %13 = vector.load %arg6[%c0_11, %c0_12] : memref<1x64xf32, #tpu.memory_space<vmem>>, vector<1x64xf32>
      %cst_13 = arith.constant 3.906250e-03 : f32
      %14 = vector.broadcast %cst_13 : f32 to vector<1x64xf32>
      %15 = arith.mulf %13, %14 : vector<1x64xf32>
      %c0_14 = arith.constant 0 : index
      %c0_15 = arith.constant 0 : index
      %16 = vector.load %arg3[%c0_14, %c0_15] : memref<4x64xf32, #tpu.memory_space<vmem>>, vector<4x64xf32>
      %cst_16 = arith.constant dense<0.000000e+00> : vector<1x4xf32>
      %17 = tpu.matmul %15, %16, %cst_16 {dimension_numbers = #tpu.dot_dimension_numbers<[1], [1], [0], [0], [0, 0, 1, 0], [], []>} : vector<1x64xf32>, vector<4x64xf32>, vector<1x4xf32> -> vector<1x4xf32>
      %cst_17 = arith.constant 0.000000e+00 : f32
      %18 = vector.broadcast %cst_17 : f32 to vector<1x4xf32>
      %19 = arith.maximumf %17, %18 : vector<1x4xf32>
      %c0_18 = arith.constant 0 : index
      %c0_19 = arith.constant 0 : index
      %20 = vector.load %arg4[%c0_18, %c0_19] : memref<4x64xf32, #tpu.memory_space<vmem>>, vector<4x64xf32>
      %cst_20 = arith.constant dense<0.000000e+00> : vector<1x64xf32>
      %21 = tpu.matmul %19, %20, %cst_20 {dimension_numbers = #tpu.dot_dimension_numbers<[1], [0], [0], [1], [0, 0, 1, 1], [], []>} : vector<1x4xf32>, vector<4x64xf32>, vector<1x64xf32> -> vector<1x64xf32>
      %22 = arith.negf %21 : vector<1x64xf32>
      %23 = math.exp %22 : vector<1x64xf32>
      %cst_21 = arith.constant 1.000000e+00 : f32
      %24 = vector.broadcast %cst_21 : f32 to vector<1x64xf32>
      %25 = arith.addf %24, %23 : vector<1x64xf32>
      %26 = arith.divf %24, %25 : vector<1x64xf32>
      %27 = vector.shape_cast %26 : vector<1x64xf32> to vector<1x1x64xf32>
      %c0_22 = arith.constant 0 : index
      %c0_23 = arith.constant 0 : index
      %c0_24 = arith.constant 0 : index
      %28 = vector.load %arg5[%c0_22, %c0_23, %c0_24] : memref<1x1x64xf32, #tpu.memory_space<vmem>>, vector<1x1x64xf32>
      tpu.vector_store %arg5[%c0_22, %c0_23, %c0_24], %27 {strides = array<i32>} : memref<1x1x64xf32, #tpu.memory_space<vmem>>, vector<1x1x64xf32>,
    } else {
    }
    return
  }
  func.func @transform_0(%arg0: i32, %arg1: i32) -> (i32, i32, i32) {
    %c0_i32 = arith.constant 0 : i32
    %c0_i32_0 = arith.constant 0 : i32
    return %arg0, %c0_i32, %arg1 : i32, i32, i32
  }
  func.func @transform_1(%arg0: i32, %arg1: i32) -> (i32, i32) {
    %c0_i32 = arith.constant 0 : i32
    %c0_i32_0 = arith.constant 0 : i32
    %c0_i32_1 = arith.constant 0 : i32
    return %c0_i32, %c0_i32_0 : i32, i32
  }
  func.func @transform_2(%arg0: i32, %arg1: i32) -> (i32, i32) {
    %c0_i32 = arith.constant 0 : i32
    %c0_i32_0 = arith.constant 0 : i32
    %c0_i32_1 = arith.constant 0 : i32
    return %c0_i32, %c0_i32_0 : i32, i32
  }
  func.func @transform_3(%arg0: i32, %arg1: i32) -> (i32, i32, i32) {
    %c0_i32 = arith.constant 0 : i32
    %c0_i32_0 = arith.constant 0 : i32
    %c0_i32_1 = arith.constant 0 : i32
    return %arg0, %c0_i32, %c0_i32_0 : i32, i32, i32
  }
}

</mosaic_0001>

<bundles_post_ra>
// kernel: tpu_custom_call.1
= control target key start
LH: loop header
LB: loop body
LE: loop exit
PB: predicated region body
PF: predicated region fallthrough
CT: control target
= control target key end

     0   :  { %8 = vsyncpa [#allocation4], 0  ;;  %s1963_s0 = inlined_call_operand.hbm [shape: f32[2,64,256], index: 0, kind: input, shape index: {}]   ;;  %s1964_s1 = inlined_call_operand.hbm [shape: f32[4,64], index: 1, kind: input, shape index: {}]   ;;  %s1965_s2 = inlined_call_operand.vmem [shape: f32[4,64], index: 2, kind: input, shape index: {}]   ;;  %s1966_s3 = inlined_call_operand.hbm [shape: f32[2,1,64], index: 3, kind: output, shape index: {}]  }
   0x1   :  { %10 = vsyncpa [#allocation4 + $0x1], 0 }
   0x2   :  { %11 = vsyncpa [#allocation7], 0 }
   0x3   :  { %12 = vsyncpa [#allocation5], 0 }
   0x4   :  { %14 = vsyncpa [#allocation5 + $0x1], 0  ;;  %s1582_s12 = smov 0   ;;  %s1584_s13 = smov 0  }
   0x5   :  { %s1586_s14 = smov 0   ;;  %s1588_s15 = smov 0  }
   0x6   :  { %s1590_s16 = smov 0   ;;  %s1592_s17 = smov 0  }
   0x7 LB: > { %s1288_s18 = sadd.s32 4294967295, %s1551_s17   ;;  %s1289_s19 = sadd.s32 4294967294, %s1551_s17   ;;  %s1551_s17 = sphi %s1592_s17, %s20_s17   ;;  %s1547_s16 = sphi %s1590_s16, %s1994_s16   ;;  %s1543_s15 = sphi %s1588_s15, %s1993_s15   ;;  %s1539_s14 = sphi %s1586_s14, %s1992_s14   ;;  %s1535_s13 = sphi %s1584_s13, %s1991_s13   ;;  %s1531_s12 = sphi %s1582_s12, %s1990_s12  }
   0x8   : > { %s41_s20 = sadd.s32 1, %s1539_s14  ;;  %p48_p0 = scmp.ne.s32.totalorder %s1539_s14, %s1535_s13 }
   0x9   : > { %p49_p1 = scmp.eq.s32.totalorder %s1551_s17, 0  ;;  %p54_p2 = scmp.ne.s32.totalorder %s1535_s13, %s1531_s12 }
   0xa   : > { %p1620_p3 = scmp.eq.s32.totalorder %s1288_s18, 0  ;;  %p120_p4 = scmp.eq.s32.totalorder %s1288_s18, 1 }
   0xb   : > { %p1624_p5 = por %p49_p1, %p48_p0  ;;  %p126_p6 = scmp.eq.s32.totalorder %s1289_s19, 1 }
   0xc   : > { %s1973_s21 = scalar_select %p1620_p3, 1, 0 }
   0xd   : > { %p1630_p7 = por %p1620_p3, %p54_p2  ;;  %p1634_p8 = por %p120_p4, %p48_p0 }
   0xe   : > { %p1638_p9 = por %p126_p6, %p54_p2  ;;  %p1290_p10 = scmp.ge.s32.totalorder %s1551_s17, 1 }
   0xf   : > { %s1975_s23 = scalar_select %p1630_p7, 1, 0 }
  0x10   : > { %s1976_s24 = scalar_select %p1634_p8, 1, 0 }
  0x11   : > { %s1977_s25 = scalar_select %p1638_p9, 1, 0 }
  0x12   : > { %p133_p11 = scmp.lt.s32.totalorder %s1551_s17, 3  ;;  %s1553_s27 = smov [#allocation6]  }
  0x13   : > { %s146_s28 = sshll.u32 %s1553_s27, 4  ;;  %p1343_p1 = scmp.lt.s32.totalorder %s1551_s17, 2  ;;  %s147_s28 = int_to_ptr.vmem [resolvable:$true] %s146_s28 }
  0x14   : > { %p1645_p13 = pnand %p1290_p10, %p133_p11  ;;  %s32_s4 = sadd.s32 1, %s1547_s16 }
  0x15   : > { %p1654_p4 = pnand %p1343_p1, %p1624_p5  ;;  %p1665_p6 = scmp.ge.s32.totalorder %s32_s4, 2 }
  0x16   : > { %s1978_s26 = scalar_select %p1645_p13, 1, 0 }
  0x17   : > { %p1330_p0 = pneg %p1645_p13  ;;  %s160_s6 = sand.u32 1, %s1539_s14  }
  0x18   : > { %s1979_s29 = scalar_select %p1654_p4, 1, 0 }
  0x19   : > { %p1660_p2 = pnand %p1330_p0, %p1620_p3  ;;  %s1407_s9 = scalar_lea.hbm %s1964_s1, 64 }
  0x1a   : > { %s1981_s5 = scalar_select %p1665_p6, 1, 0 }
  0x1b   : > { %p1408_p5 = scmp.ne.s32.totalorder %s1964_s1, %s1407_s9  ;;  %p1409_p10 = pneg %p1660_p2 }
  0x1c   : > { %p1414_p0 = scmp.lt.u32.totalorder %s1407_s9, %s1964_s1 }
  0x1d   : > { %p1410_p11 = pnand %p1409_p10, %p1408_p5 }
  0x1f   : > { %p1411_p1 = pneg %p1410_p11 }
  0x21   : > { %p1416_p12 = pnand %p1414_p0, %p1411_p1 }
  0x23   : > { %1419 = shalt.err (!%p1416_p12)
}
  0x24   : > { %s1420_s22 = scalar_lea.vmem %s147_s28, 64  ;;  %p1428_p7 = scmp.lt.s32.totalorder %s147_s28, %s147_s28 }
  0x25   : > { %p1421_p9 = scmp.ne.s32.totalorder %s147_s28, %s1420_s22  ;;  %p1429_p13 = scmp.lt.s32.totalorder %s1420_s22, %s1420_s22 }
  0x27   : > { %p1423_p8 = pnand %p1421_p9, %p1409_p10  ;;  %p1430_p4 = por %p1429_p13, %p1428_p7 }
  0x29   : > { %p1424_p3 = pneg %p1423_p8 }
  0x2b   : > { %p1431_p6 = pnand %p1430_p4, %p1424_p3 }
  0x2d   : > { %1434 = shalt.err (!%p1431_p6)
}
  0x2e   : > { %1333 = dma.hbm_to_vmem [thread:$0]  (!%p1660_p2), %s1964_s1, 64, %s147_s28, [#allocation7]  }
  0x2f   : > { %p1982_p9 = scmp.ne.s32.totalorder %s1981_s5, 0  ;;  %s1293_s8 = sshll.u32 %s160_s6, 7 }
  0x30   : > { %s1307_s10 = sshll.u32 %s1547_s16, 11  ;;  %s164_s19 = scalar_lea.vmem [#allocation3], %s1293_s8 }
  0x31   : > { %s1996_s4 = smov (%p1982_p9, %s32_s4), 0  ;;  %s1696_s18 = scalar_lea.hbm %s1963_s0, %s1307_s10 }
  0x32   : > { %s36_s9 = ssub.s32 %s1547_s16, %s1996_s4  ;;  %s173_s22 = sshll.u32 %s164_s19, 4  ;;  %s1703_s22 = int_to_ptr.vmem [resolvable:$true] %s173_s22 }
  0x33   : > { %p39_p3 = scmp.eq.s32.totalorder %s36_s9, 0  ;;  %s1705_s5 = scalar_lea.sflag [#allocation4], %s160_s6 }
  0x34   : > { %s1435_s27 = scalar_lea.hbm %s1696_s18, 2048  ;;  %p1983_p8 = scmp.ne.s32.totalorder %s1979_s29, 0 }
  0x35   : > { %s1701_s28 = scalar_select %p39_p3, %s1539_s14, %s41_s20  }
  0x36   : > { %p1436_p7 = scmp.ne.s32.totalorder %s1696_s18, %s1435_s27  ;;  %p1437_p12 = pneg %p1983_p8 }
  0x37   : > { %s1440_s8 = scalar_lea.hbm %s1963_s0, 4096  ;;  %p1441_p2 = scmp.lt.u32.totalorder %s1696_s18, %s1963_s0 }
  0x38   : > { %p1438_p13 = pnand %p1437_p12, %p1436_p7  ;;  %p1442_p6 = scmp.lt.u32.totalorder %s1440_s8, %s1435_s27 }
  0x39   : > { %p1444_p10 = scmp.lt.u32.totalorder %s1435_s27, %s1696_s18 }
  0x3a   : > { %p1439_p4 = pneg %p1438_p13  ;;  %p1443_p5 = por %p1442_p6, %p1441_p2 }
  0x3c   : > { %p1445_p11 = por %p1444_p10, %p1443_p5 }
  0x3e   : > { %p1446_p1 = pnand %p1445_p11, %p1439_p4 }
  0x40   : > { %1449 = shalt.err (!%p1446_p1)
}
  0x41   : > { %s1450_s20 = scalar_lea.vmem %s1703_s22, 2048  ;;  %s1554_s6 = smov [#allocation3]  }
  0x42   : > { %p1451_p0 = scmp.ne.s32.totalorder %s1703_s22, %s1450_s20  ;;  %s1455_s11 = sshll.u32 %s1554_s6, 4  ;;  %s1456_s11 = int_to_ptr.vmem [resolvable:$false] %s1455_s11 }
  0x43   : > { %s1457_s19 = scalar_lea.vmem %s1456_s11, 4096  ;;  %p1458_p7 = scmp.lt.s32.totalorder %s1703_s22, %s1456_s11 }
  0x44   : > { %p1453_p9 = pnand %p1451_p0, %p1437_p12  ;;  %p1459_p13 = scmp.lt.s32.totalorder %s1457_s19, %s1450_s20 }
  0x46   : > { %p1454_p3 = pneg %p1453_p9  ;;  %p1460_p2 = por %p1459_p13, %p1458_p7 }
  0x48   : > { %p1461_p6 = pnand %p1460_p2, %p1454_p3 }
  0x4a   : > { %1464 = shalt.err (!%p1461_p6)
}
  0x4b   : > { %s1555_s27 = smov 256   ;;  %s1556_s7 = smov 16  }
  0x4c   : > { %1337 = dma.hbm_to_vmem [thread:$0]  (!%p1983_p8), %s1696_s18, 2048, %s1703_s22, %s1705_s5, %s1555_s27, %s1555_s27, %s1556_s7  }
  0x4d   : > { %p1984_p12 = scmp.ne.s32.totalorder %s1978_s26, 0 }
  0x4e   : > { %s1736_s9 = sand.u32 (!%p1984_p12), 1, %s1535_s13   ;;  %p1985_p4 = scmp.ne.s32.totalorder (!%p1984_p12), %s1975_s23, 0 }
  0x4f   : > { %185 = sbr.rel (%p1984_p12) target bundleno = 897 (0x381), region = 32  ;;  %s1297_s8 = sshll.u32 (!%p1984_p12), %s1736_s9, 7 }
  0x50   : > { %s188_s10 = scalar_lea.sflag (!%p1984_p12), [#allocation4], %s1736_s9  ;;  %s191_s30 = scalar_lea.vmem (!%p1984_p12), [#allocation3], %s1297_s8 }
  0x56   : > { %1518 = dma.done.wait (%p1985_p4), %s188_s10, 2048  }
  0x57   : > { %1520 = vsyncadd (%p1985_p4), %s188_s10, 4294965248  ;;  %p1986_p5 = scmp.ne.s32.totalorder %s1973_s21, 0 }
  0x59   : > { %1522 = dma.done.wait (%p1986_p5), [#allocation7], 64  }
  0x5a   : > { %1524 = vsyncadd (%p1986_p5), [#allocation7], 4294967232  ;;  %v224_v0 = vld [vmem:[%s191_s30] sm:$0xff]  ;;  %v232_v1 = vld [vmem:[%s191_s30 + $0x8] sm:$0xff]  ;;  %v1557_v24 = vmov 0   ;;  %v273_v25 = vlaneseq  ;;  %vm222_vm0 = vcmask 516096  }
  0x5b   : > { %v225_v2 = vld [vmem:[%s191_s30 + $0x10] sm:$0xff]  ;;  %v240_v3 = vadd.f32 %v232_v1, %v224_v0  ;;  %v233_v4 = vld [vmem:[%s191_s30 + $0x18] sm:$0xff]  ;;  %v226_v5 = vld [vmem:[%s191_s30 + $0x20] sm:$0xff]  ;;  %1401 = vset.pattern.permute.xlu0 %v1557_v24  ;;  %1402 = vset.pattern.permute.xlu1 %v1557_v24  ;;  %v1558_v26 = vmov 1966171168   ;;  %vm1024_vm1 = vcmask 523264  }
  0x5c   : > { %v234_v6 = vld [vmem:[%s191_s30 + $0x28] sm:$0xff]  ;;  %v227_v8 = vld [vmem:[%s191_s30 + $0x30] sm:$0xff]  ;;  %v235_v9 = vld [vmem:[%s191_s30 + $0x38] sm:$0xff]  ;;  %v241_v10 = vadd.f32 %v233_v4, %v225_v2  ;;  %v534_v27 = vunpack.c.l.s4 %v1558_v26  ;;  %v1749_v28 = vshrl.u32 %v273_v25, 7  ;;  %vm1560_vm2 = vmmov 0   ;;  %s1304_s26 = sshll.u32 %s1543_s15, 4 }
  0x5d   : > { %v242_v7 = vadd.f32 %v234_v6, %v226_v5  ;;  %249 = vadd.xlane.f32.xlu0 %v240_v3  ;;  %v243_v11 = vadd.f32 %v235_v9, %v227_v8  ;;  %v228_v12 = vld [vmem:[%s191_s30 + $0x40] sm:$0xff]  ;;  %v236_v13 = vld [vmem:[%s191_s30 + $0x48] sm:$0xff]  ;;  %v229_v14 = vld [vmem:[%s191_s30 + $0x50] sm:$0xff]  ;;  %vm956_vm3 = vcmask 130112   ;;  %vm963_vm4 = vcmask 195712   ;;  %s216_s29 = scalar_lea.vmem [#allocation8], %s1736_s9  ;;  %s1913_s20 = scalar_lea.hbm %s1966_s3, %s1304_s26 }
  0x5e   : > { %v237_v15 = vld [vmem:[%s191_s30 + $0x58] sm:$0xff]  ;;  %v244_v16 = vadd.f32 %v236_v13, %v228_v12  ;;  %v230_v18 = vld [vmem:[%s191_s30 + $0x60] sm:$0xff]  ;;  %v238_v19 = vld [vmem:[%s191_s30 + $0x68] sm:$0xff]  ;;  %v535_v29 = vunpack.c.0.s8 %v534_v27  ;;  %v1752_v30 = vsub.s32 0, %v1749_v28  ;;  %v1755_v31 = vsub.s32 1, %v1749_v28  ;;  %s1201_s18 = sshll.u32 %s216_s29, 4  ;;  %s1915_s18 = int_to_ptr.vmem [resolvable:$true] %s1201_s18 }
  0x5f   : > { %253 = vadd.xlane.f32.xlu1 %v242_v7  ;;  %v245_v17 = vadd.f32 %v237_v15, %v229_v14  ;;  %v231_v20 = vld [vmem:[%s191_s30 + $0x70] sm:$0xff]  ;;  %v239_v21 = vld [vmem:[%s191_s30 + $0x78] sm:$0xff]  ;;  %v246_v22 = vadd.f32 %v238_v19, %v230_v18  ;;  %v1758_v32 = vsub.s32 2, %v1749_v28  ;;  %v1761_v33 = vsub.s32 3, %v1749_v28  ;;  %s1189_s6 = scalar_lea.sflag [#allocation5], %s1736_s9  ;;  %s1465_s11 = scalar_lea.vmem %s1915_s18, 16 }
  0x60   : > { %v247_v23 = vadd.f32 %v239_v21, %v231_v20  ;;  %v1764_v34 = vsub.s32 4, %v1749_v28  ;;  %v1767_v35 = vsub.s32 5, %v1749_v28  ;;  %v1770_v36 = vsub.s32 6, %v1749_v28  ;;  %p1466_p8 = scmp.ne.s32.totalorder %s1915_s18, %s1465_s11  ;;  %p1987_p10 = scmp.ne.s32.totalorder %s1976_s24, 0 }
  0x61   : > { %251 = vadd.xlane.f32.xlu0 %v241_v10  ;;  %v1773_v37 = vsub.s32 7, %v1749_v28  ;;  %v1776_v39 = vsub.s32 %v535_v29, %v1749_v28  ;;  %vm970_vm5 = vcmask 261312   ;;  %vm977_vm6 = vcmask 326912   ;;  %s1561_s15 = smov [#allocation8]  }
  0x62   : > { %vm984_vm7 = vcmask 392512   ;;  %vm991_vm8 = vcmask 458112   ;;  %vm998_vm9 = vcmask 523712   ;;  %vm1107_vm10 = vcmask 1043456   ;;  %p1467_p11 = pnand %p1466_p8, %p1987_p10  ;;  %s1469_s19 = sshll.u32 %s1561_s15, 4  ;;  %s1470_s19 = int_to_ptr.vmem [resolvable:$false] %s1469_s19 }
  0x63   : > { %255 = vadd.xlane.f32.xlu1 %v243_v11  ;;  %vm1103_vm11 = vcmask 31744   ;;  %s1471_s27 = scalar_lea.vmem %s1470_s19, 32  ;;  %p1472_p0 = scmp.lt.s32.totalorder %s1915_s18, %s1470_s19 }
  0x64   : > { %p1468_p1 = pneg %p1467_p11  ;;  %p1473_p9 = scmp.lt.s32.totalorder %s1471_s27, %s1465_s11 }
  0x65   : > { %257 = vadd.xlane.f32.xlu0 %v244_v16 }
  0x66   : > { %p1474_p3 = por %p1473_p9, %p1472_p0 }
  0x67   : > { %259 = vadd.xlane.f32.xlu1 %v245_v17 }
  0x68   : > { %p1475_p7 = pnand %p1474_p3, %p1468_p1 }
  0x69   : > { %261 = vadd.xlane.f32.xlu0 %v246_v22 }
  0x6b   : > { %263 = vadd.xlane.f32.xlu1 %v247_v23 }
  0xea   : > { %v250_v38 = vpop.xlane.xlu0 %249 }
  0xeb   : > { %v276_v41 = vrot.slane %v250_v38, %v1752_v30  ;;  %v280_v42 = vrot.slane %v250_v38, %v1755_v31  ;;  %v284_v43 = vrot.slane %v250_v38, %v1758_v32  ;;  %v288_v44 = vrot.slane %v250_v38, %v1761_v33 }
  0xec   : > { %v254_v40 = vpop.xlane.xlu1 %253  ;;  %v292_v45 = vrot.slane %v250_v38, %v1764_v34  ;;  %v296_v46 = vrot.slane %v250_v38, %v1767_v35  ;;  %v300_v47 = vrot.slane %v250_v38, %v1770_v36  ;;  %v304_v48 = vrot.slane %v250_v38, %v1773_v37 }
  0xed   : > { %v529_v49 = vcombine.low %v276_v41, %v280_v42  ;;  %v530_v50 = vcombine.low %v284_v43, %v288_v44  ;;  %v340_v51 = vrot.slane %v254_v40, %v1752_v30  ;;  %v344_v52 = vrot.slane %v254_v40, %v1755_v31 }
  0xee   : > { %v252_v53 = vpop.xlane.xlu0 %251  ;;  %v531_v54 = vcombine.low %v292_v45, %v296_v46  ;;  %v532_v55 = vcombine.low %v300_v47, %v304_v48  ;;  %v348_v56 = vrot.slane %v254_v40, %v1758_v32  ;;  %v352_v57 = vrot.slane %v254_v40, %v1761_v33 }
  0xef   : > { %v539_v58 = vrot.slane %v529_v49, %v1776_v39  ;;  %v546_v59 = vrot.slane %v530_v50, %v1776_v39  ;;  %v308_v60 = vrot.slane %v252_v53, %v1752_v30  ;;  %v312_v61 = vrot.slane %v252_v53, %v1755_v31 }
  0xf0   : > { %v553_v62 = vrot.slane %v531_v54, %v1776_v39  ;;  %v560_v63 = vrot.slane %v532_v55, %v1776_v39  ;;  %v316_v0 = vrot.slane %v252_v53, %v1758_v32  ;;  %v320_v1 = vrot.slane %v252_v53, %v1761_v33  ;;  %v256_v14 = vpop.xlane.xlu1 %255 }
  0xf1   : > { %v561_v2 = vcombine.low %v539_v58, %v546_v59  ;;  %v324_v3 = vrot.slane %v252_v53, %v1764_v34  ;;  %v328_v4 = vrot.slane %v252_v53, %v1767_v35  ;;  %v332_v5 = vrot.slane %v252_v53, %v1770_v36 }
  0xf2   : > { %v562_v6 = vcombine.low %v553_v62, %v560_v63  ;;  %v336_v7 = vrot.slane %v252_v53, %v1773_v37  ;;  %v578_v8 = vcombine.low %v308_v60, %v312_v61  ;;  %v579_v9 = vcombine.low %v316_v0, %v320_v1  ;;  %v258_v50 = vpop.xlane.xlu0 %257 }
  0xf3   : > { %v569_v10 = vrot.slane %v561_v2, %v1776_v39  ;;  %v580_v11 = vcombine.low %v324_v3, %v328_v4  ;;  %v356_v12 = vrot.slane %v254_v40, %v1764_v34  ;;  %v360_v13 = vrot.slane %v254_v40, %v1767_v35 }
  0xf4   : > { %v576_v15 = vrot.slane %v562_v6, %v1776_v39  ;;  %v581_v16 = vcombine.low %v332_v5, %v336_v7  ;;  %v588_v17 = vrot.slane %v578_v8, %v1776_v39  ;;  %v595_v18 = vrot.slane %v579_v9, %v1776_v39  ;;  %v260_v3 = vpop.xlane.xlu1 %259 }
  0xf5   : > { %v602_v19 = vrot.slane %v580_v11, %v1776_v39  ;;  %v364_v20 = vrot.slane %v254_v40, %v1770_v36  ;;  %v368_v21 = vrot.slane %v254_v40, %v1773_v37  ;;  %v627_v22 = vcombine.low %v340_v51, %v344_v52 }
  0xf6   : > { %v577_v23 = vcombine.low %v569_v10, %v576_v15  ;;  %v609_v24 = vrot.slane %v581_v16, %v1776_v39  ;;  %v610_v26 = vcombine.low %v588_v17, %v595_v18  ;;  %v628_v27 = vcombine.low %v348_v56, %v352_v57 }
  0xf7   : > { %v629_v29 = vcombine.low %v356_v12, %v360_v13  ;;  %v630_v38 = vcombine.low %v364_v20, %v368_v21  ;;  %v637_v41 = vrot.slane %v627_v22, %v1776_v39  ;;  %v372_v42 = vrot.slane %v256_v14, %v1752_v30 }
  0xf8   : > { %922 = vperm.xlu0 %1401, %v577_v23   ;;  %v611_v43 = vcombine.low %v602_v19, %v609_v24  ;;  %v618_v44 = vrot.slane %v610_v26, %v1776_v39  ;;  %v644_v45 = vrot.slane %v628_v27, %v1776_v39  ;;  %v376_v40 = vrot.slane %v256_v14, %v1755_v31 }
  0xf9   : > { %v651_v46 = vrot.slane %v629_v29, %v1776_v39  ;;  %v658_v47 = vrot.slane %v630_v38, %v1776_v39  ;;  %v380_v48 = vrot.slane %v256_v14, %v1758_v32  ;;  %v384_v49 = vrot.slane %v256_v14, %v1761_v33  ;;  %v262_v38 = vpop.xlane.xlu0 %261 }
  0xfa   : > { %v625_v51 = vrot.slane %v611_v43, %v1776_v39  ;;  %v659_v52 = vcombine.low %v637_v41, %v644_v45  ;;  %v388_v53 = vrot.slane %v256_v14, %v1764_v34  ;;  %v392_v54 = vrot.slane %v256_v14, %v1767_v35 }
  0xfb   : > { %v660_v55 = vcombine.low %v651_v46, %v658_v47  ;;  %v396_v56 = vrot.slane %v256_v14, %v1770_v36  ;;  %v400_v57 = vrot.slane %v256_v14, %v1773_v37  ;;  %v676_v58 = vcombine.low %v372_v42, %v376_v40 }
  0xfc   : > { %v626_v59 = vcombine.low %v618_v44, %v625_v51  ;;  %v667_v60 = vrot.slane %v659_v52, %v1776_v39  ;;  %v677_v61 = vcombine.low %v380_v48, %v384_v49  ;;  %v678_v62 = vcombine.low %v388_v53, %v392_v54 }
  0xfd   : > { %v674_v63 = vrot.slane %v660_v55, %v1776_v39  ;;  %v679_v0 = vcombine.low %v396_v56, %v400_v57  ;;  %v686_v1 = vrot.slane %v676_v58, %v1776_v39  ;;  %v404_v2 = vrot.slane %v258_v50, %v1752_v30 }
  0xfe   : > { %925 = vperm.xlu1 %1402, %v626_v59   ;;  %v693_v4 = vrot.slane %v677_v61, %v1776_v39  ;;  %v700_v5 = vrot.slane %v678_v62, %v1776_v39  ;;  %v408_v6 = vrot.slane %v258_v50, %v1755_v31  ;;  %v412_v7 = vrot.slane %v258_v50, %v1758_v32 }
  0xff   : > { %v675_v8 = vcombine.low %v667_v60, %v674_v63  ;;  %v707_v9 = vrot.slane %v679_v0, %v1776_v39  ;;  %v416_v10 = vrot.slane %v258_v50, %v1761_v33  ;;  %v420_v11 = vrot.slane %v258_v50, %v1764_v34  ;;  %v264_v60 = vpop.xlane.xlu1 %263 }
 0x100   : > { %v708_v12 = vcombine.low %v686_v1, %v693_v4  ;;  %v424_v13 = vrot.slane %v258_v50, %v1767_v35  ;;  %v428_v14 = vrot.slane %v258_v50, %v1770_v36  ;;  %v432_v15 = vrot.slane %v258_v50, %v1773_v37 }
 0x101   : > { %v709_v16 = vcombine.low %v700_v5, %v707_v9  ;;  %v725_v17 = vcombine.low %v404_v2, %v408_v6  ;;  %v726_v18 = vcombine.low %v412_v7, %v416_v10  ;;  %v436_v19 = vrot.slane %v260_v3, %v1752_v30 }
 0x102   : > { %928 = vperm.xlu1 %1402, %v675_v8   ;;  %v716_v20 = vrot.slane %v708_v12, %v1776_v39  ;;  %v727_v21 = vcombine.low %v420_v11, %v424_v13  ;;  %v728_v22 = vcombine.low %v428_v14, %v432_v15  ;;  %v440_v23 = vrot.slane %v260_v3, %v1755_v31 }
 0x103   : > { %v723_v24 = vrot.slane %v709_v16, %v1776_v39  ;;  %v735_v26 = vrot.slane %v725_v17, %v1776_v39  ;;  %v742_v27 = vrot.slane %v726_v18, %v1776_v39  ;;  %v444_v29 = vrot.slane %v260_v3, %v1758_v32 }
 0x104   : > { %v749_v41 = vrot.slane %v727_v21, %v1776_v39  ;;  %v756_v42 = vrot.slane %v728_v22, %v1776_v39  ;;  %v448_v43 = vrot.slane %v260_v3, %v1761_v33  ;;  %v452_v44 = vrot.slane %v260_v3, %v1764_v34 }
 0x105   : > { %v724_v45 = vcombine.low %v716_v20, %v723_v24  ;;  %v757_v40 = vcombine.low %v735_v26, %v742_v27  ;;  %v456_v46 = vrot.slane %v260_v3, %v1767_v35  ;;  %v460_v47 = vrot.slane %v260_v3, %v1770_v36 }
 0x106   : > { %v758_v48 = vcombine.low %v749_v41, %v756_v42  ;;  %v464_v49 = vrot.slane %v260_v3, %v1773_v37  ;;  %v774_v50 = vcombine.low %v436_v19, %v440_v23  ;;  %v775_v51 = vcombine.low %v444_v29, %v448_v43 }
 0x107   : > { %931 = vperm.xlu1 %1402, %v724_v45   ;;  %v765_v52 = vrot.slane %v757_v40, %v1776_v39  ;;  %v776_v53 = vcombine.low %v452_v44, %v456_v46  ;;  %v468_v54 = vrot.slane %v262_v38, %v1752_v30  ;;  %v472_v55 = vrot.slane %v262_v38, %v1755_v31 }
 0x108   : > { %v772_v56 = vrot.slane %v758_v48, %v1776_v39  ;;  %v777_v57 = vcombine.low %v460_v47, %v464_v49  ;;  %v784_v58 = vrot.slane %v774_v50, %v1776_v39  ;;  %v791_v59 = vrot.slane %v775_v51, %v1776_v39  ;;  %v1023_v49 = vld [vmem:[#allocation6] sm:$0xf] }
 0x109   : > { %v798_v61 = vrot.slane %v776_v53, %v1776_v39  ;;  %v476_v62 = vrot.slane %v262_v38, %v1758_v32  ;;  %v480_v63 = vrot.slane %v262_v38, %v1761_v33  ;;  %v484_v0 = vrot.slane %v262_v38, %v1764_v34 }
 0x10a   : > { %v773_v1 = vcombine.low %v765_v52, %v772_v56  ;;  %v805_v2 = vrot.slane %v777_v57, %v1776_v39  ;;  %v806_v3 = vcombine.low %v784_v58, %v791_v59  ;;  %v488_v4 = vrot.slane %v262_v38, %v1767_v35 }
 0x10b   : > { %v492_v5 = vrot.slane %v262_v38, %v1770_v36  ;;  %v496_v6 = vrot.slane %v262_v38, %v1773_v37  ;;  %v823_v7 = vcombine.low %v468_v54, %v472_v55  ;;  %v824_v8 = vcombine.low %v476_v62, %v480_v63 }
 0x10c   : > { %934 = vperm.xlu1 %1402, %v773_v1   ;;  %v807_v9 = vcombine.low %v798_v61, %v805_v2  ;;  %v814_v10 = vrot.slane %v806_v3, %v1776_v39  ;;  %v825_v11 = vcombine.low %v484_v0, %v488_v4  ;;  %v500_v12 = vrot.slane %v264_v60, %v1752_v30 }
 0x10d   : > { %v826_v13 = vcombine.low %v492_v5, %v496_v6  ;;  %v833_v14 = vrot.slane %v823_v7, %v1776_v39  ;;  %v840_v15 = vrot.slane %v824_v8, %v1776_v39  ;;  %v504_v16 = vrot.slane %v264_v60, %v1755_v31 }
 0x10e   : > { %v821_v17 = vrot.slane %v807_v9, %v1776_v39  ;;  %v847_v18 = vrot.slane %v825_v11, %v1776_v39  ;;  %v508_v19 = vrot.slane %v264_v60, %v1758_v32  ;;  %v512_v20 = vrot.slane %v264_v60, %v1761_v33 }
 0x10f   : > { %v854_v21 = vrot.slane %v826_v13, %v1776_v39  ;;  %v855_v22 = vcombine.low %v833_v14, %v840_v15  ;;  %v516_v30 = vrot.slane %v264_v60, %v1764_v34  ;;  %v520_v23 = vrot.slane %v264_v60, %v1767_v35 }
 0x110   : > { %v822_v24 = vcombine.low %v814_v10, %v821_v17  ;;  %v524_v26 = vrot.slane %v264_v60, %v1770_v36  ;;  %v528_v31 = vrot.slane %v264_v60, %v1773_v37  ;;  %v872_v27 = vcombine.low %v500_v12, %v504_v16 }
 0x111   : > { %v856_v29 = vcombine.low %v847_v18, %v854_v21  ;;  %v863_v38 = vrot.slane %v855_v22, %v1776_v39  ;;  %v873_v41 = vcombine.low %v508_v19, %v512_v20  ;;  %v874_v32 = vcombine.low %v516_v30, %v520_v23 }
 0x112   : > { %937 = vperm.xlu1 %1402, %v822_v24   ;;  %v875_v33 = vcombine.low %v524_v26, %v528_v31  ;;  %v882_v42 = vrot.slane %v872_v27, %v1776_v39  ;;  %v1559_v48 = vmov 0.0   ;;  %v946_v53 = vand.u32 127, %v273_v25 }
 0x113   : > { %v870_v43 = vrot.slane %v856_v29, %v1776_v39  ;;  %v889_v34 = vrot.slane %v873_v41, %v1776_v39  ;;  %v896_v35 = vrot.slane %v874_v32, %v1776_v39  ;;  %223 = vst.msk [vmem:[#allocation2] sm:$0x1] %vm222_vm0, %v1559_v48  ;;  %1312 = vmatprep.subr.mxu0 %v1559_v48  ;;  %v1102_v29 = vld [vmem:[%s1965_s2] sm:$0xf] }
 0x114   : > { %v903_v36 = vrot.slane %v875_v33, %v1776_v39  ;;  %1317 = vmatprep.subr.mxu1 %v1559_v48  ;;  %1313 = vmatpush3.xpose.msk.msra.mxu0 %vm1024_vm1, %v1023_v49  ;;  %v951_v55 = vadd.s32 4294967288, %v946_v53  ;;  %v958_v56 = vadd.s32 4294967280, %v946_v53  ;;  %v965_v57 = vadd.s32 4294967272, %v946_v53 }
 0x115   : > { %v871_v44 = vcombine.low %v863_v38, %v870_v43  ;;  %v904_v37 = vcombine.low %v882_v42, %v889_v34  ;;  %1314 = vmatprep.mubr.msk.f32.mxu0 %vm1560_vm2, %v1559_v48  ;;  %1319 = vmatprep.mubr.msk.f32.mxu1 %vm1560_vm2, %v1559_v48  ;;  %v972_v58 = vadd.s32 4294967264, %v946_v53  ;;  %v979_v60 = vadd.s32 4294967256, %v946_v53 }
 0x116   : > { %v905_v45 = vcombine.low %v896_v35, %v903_v36  ;;  %v954_v59 = vsub.s32 %v951_v55, %v1749_v28  ;;  %v961_v61 = vsub.s32 %v958_v56, %v1749_v28  ;;  %v986_v63 = vadd.s32 4294967248, %v946_v53  ;;  %1318 = vmatpush3.msk.msra.mxu1 %vm1107_vm10, %v1102_v29 }
 0x117   : > { %940 = vperm.xlu1 %1402, %v871_v44   ;;  %v912_v40 = vrot.slane %v904_v37, %v1776_v39  ;;  %v949_v0 = vsub.s32 %v946_v53, %v1749_v28  ;;  %v968_v1 = vsub.s32 %v965_v57, %v1749_v28  ;;  %v975_v3 = vsub.s32 %v972_v58, %v1749_v28 }
 0x118   : > { %v919_v46 = vrot.slane %v905_v45, %v1776_v39  ;;  %v982_v4 = vsub.s32 %v979_v60, %v1749_v28  ;;  %v993_v5 = vadd.s32 4294967240, %v946_v53  ;;  %v989_v7 = vsub.s32 %v986_v63, %v1749_v28 }
 0x11a   : > { %v920_v47 = vcombine.low %v912_v40, %v919_v46  ;;  %v996_v14 = vsub.s32 %v993_v5, %v1749_v28  ;;  %v248_v24 = vld [vmem:[#allocation2] sm:$0x1] }
 0x11c   : > { %943 = vperm.xlu1 %1402, %v920_v47  }
 0x177   : > { %v923_v2 = vpop.permute.xlu0 %922 }
 0x178   : > { %v950_v8 = vrot.slane %v923_v2, %v949_v0 }
 0x17d   : > { %v926_v50 = vpop.permute.xlu1 %925 }
 0x17e   : > { %v955_v25 = vrot.slane %v926_v50, %v954_v59 }
 0x180   : > { %v957_v12 = vsel %vm956_vm3, %v955_v25, %v950_v8 }
 0x181   : > { %v929_v51 = vpop.permute.xlu1 %928 }
 0x182   : > { %v962_v6 = vrot.slane %v929_v51, %v961_v61 }
 0x184   : > { %v964_v15 = vsel %vm963_vm4, %v962_v6, %v957_v12 }
 0x186   : > { %v932_v52 = vpop.permute.xlu1 %931 }
 0x187   : > { %v969_v9 = vrot.slane %v932_v52, %v968_v1 }
 0x189   : > { %v971_v17 = vsel %vm970_vm5, %v969_v9, %v964_v15 }
 0x18b   : > { %v935_v54 = vpop.permute.xlu1 %934 }
 0x18c   : > { %v976_v11 = vrot.slane %v935_v54, %v975_v3 }
 0x18e   : > { %v978_v18 = vsel %vm977_vm6, %v976_v11, %v971_v17 }
 0x191   : > { %v938_v62 = vpop.permute.xlu1 %937 }
 0x192   : > { %v983_v13 = vrot.slane %v938_v62, %v982_v4 }
 0x194   : > { %v985_v20 = vsel %vm984_vm7, %v983_v13, %v978_v18 }
 0x196   : > { %v941_v10 = vpop.permute.xlu1 %940 }
 0x197   : > { %v990_v16 = vrot.slane %v941_v10, %v989_v7 }
 0x199   : > { %v992_v22 = vsel %vm991_vm8, %v990_v16, %v985_v20 }
 0x19b   : > { %v944_v19 = vpop.permute.xlu1 %943 }
 0x19c   : > { %v997_v21 = vrot.slane %v944_v19, %v996_v14 }
 0x19e   : > { %v999_v30 = vsel %vm998_vm9, %v997_v21, %v992_v22 }
 0x19f   : > { %v1006_v23 = vrot.slane %v999_v30, %v1776_v39 }
 0x1a1   : > { %v1013_v26 = vrot.slane %v1006_v23, %v1776_v39 }
 0x1a3   : > { %v1015_v31 = vadd.f32 %v1013_v26, %v248_v24 }
 0x1a5   : > { %1017 = vst.msk [vmem:[#allocation2] sm:$0x1] %vm222_vm0, %v1015_v31 }
 0x1ac   : > { %v1021_v28 = vld [vmem:[#allocation2] sm:$0x1] }
 0x1ad   : > { %v1022_v27 = vmul.f32 0.00390625, %v1021_v28 }
 0x1af   : > { %1315 = vmatmul.mubr.msk.f32.vlgmr.msra.gmra.mrb[0].mxu0 %vm1024_vm1, %v1022_v27 }
 0x282   : > { %v1097_v38 = vpop.f32.mrb[0].mxu0 }
 0x283   : > { %v1101_v41 = vmax.f32 %v1097_v38, 0.0  ;;  %v1316_v32 = vpop.f32.mrb[1].mxu0 }
 0x285   : > { %1320 = vmatmul.mubr.msk.f32.vlgmr.msra.gmra.mrb[0].mxu1 %vm1103_vm11, %v1101_v41 }
 0x358   : > { %v1177_v39 = vpop.f32.mrb[0].mxu1 }
 0x359   : > { %v1303_v33 = vmul.f32 -1.442695, %v1177_v39  ;;  %v1321_v42 = vpop.f32.mrb[1].mxu1 }
 0x35b   : > { %1403 = vpow2.f32 %v1303_v33 }
 0x365   : > { %v1404_v43 = vpop.eup %1403 }
 0x366   : > { %v1184_v34 = vadd.f32 1.0, %v1404_v43 }
 0x368   : > { %1405 = vrcp.f32 %v1184_v34 }
 0x372   : > { %v1406_v35 = vpop.eup %1405 }
 0x373   : > { %1187 = vst.msk [vmem:[%s216_s29] sm:$0x1] %vm222_vm0, %v1406_v35 }
 0x374   : > { %1478 = shalt.err (!%p1475_p7)
}
 0x375   : > { %s1479_s7 = scalar_lea.hbm %s1913_s20, 16  ;;  %s1483_s10 = scalar_lea.hbm %s1966_s3, 32 }
 0x376   : > { %p1480_p13 = scmp.ne.s32.totalorder %s1913_s20, %s1479_s7  ;;  %p1484_p12 = scmp.lt.u32.totalorder %s1913_s20, %s1966_s3 }
 0x377   : > { %p1485_p4 = scmp.lt.u32.totalorder %s1483_s10, %s1479_s7  ;;  %p1487_p8 = scmp.lt.u32.totalorder %s1479_s7, %s1913_s20 }
 0x378   : > { %p1481_p2 = pnand %p1480_p13, %p1987_p10 }
 0x379   : > { %p1486_p5 = por %p1485_p4, %p1484_p12 }
 0x37a   : > { %p1482_p6 = pneg %p1481_p2 }
 0x37b   : > { %p1488_p11 = por %p1487_p8, %p1486_p5 }
 0x37d   : > { %p1489_p1 = pnand %p1488_p11, %p1482_p6 }
 0x37f   : > { %1492 = shalt.err (!%p1489_p1)
}
 0x380   : > { %1328 = dma.vmem_to_hbm [thread:$0]  (%p1987_p10), %s1915_s18, 16, %s1913_s20, %s1189_s6  }
 0x381 PF: > { %s1213_s23 = sand.u32 1, %s1531_s12   ;;  %p1988_p0 = scmp.ne.s32.totalorder %s1977_s25, 0 }
 0x382   : > { %p1989_p9 = scmp.ge.s32.totalorder %s1551_s17, 2  ;;  %s1214_s26 = scalar_lea.sflag [#allocation5], %s1213_s23 }
 0x384   : > { %p1339_p3 = pnand %p1989_p9, %p1988_p0 }
 0x386   : > { %1526 = dma.done.wait (!%p1339_p3), %s1214_s26, 16  }
 0x387   : > { %1528 = vsyncadd (!%p1339_p3), %s1214_s26, 4294967280  ;;  %s20_s17 = sadd.s32 1, %s1551_s17   ;;  %s1990_s12 = smov %s1535_s13 }
 0x388   : > { %p17_p7 = scmp.ge.s32.totalorder %s20_s17, 4   ;;  %s1991_s13 = smov %s1539_s14 }
 0x389   : > { %s1992_s14 = smov %s1701_s28  ;;  %s1993_s15 = smov %s1547_s16 }
 0x38a   : > { %s1994_s16 = smov %s1996_s4  ;;  %19 = sbr.rel (!%p17_p7) target bundleno = 7 (0x7), region = 89 }
 0x391   :  { %1218 = vsyncpa [#allocation4], 1 }
 0x392   :  { %1220 = vsyncpa [#allocation4 + $0x1], 1 }
 0x393   :  { %1221 = vsyncpa [#allocation7], 1 }
 0x394   :  { %1222 = vsyncpa [#allocation5], 1 }
 0x395   :  { %1224 = vsyncpa [#allocation5 + $0x1], 1 }

</bundles_post_ra>
